<compile_context>
chip_gen: v7x
topology: tpu7x:2x2x1
jax: 0.10.0
libtpu: 0.0.40
codegen_flags: <defaults>
</compile_context>

<pallas_src>
import jax
import jax.numpy as jnp
from jax.experimental import pallas as pl
from jax.experimental.pallas import tpu as pltpu  # noqa: F401  (kept for TPU-specific tuning at scale)

# ---- model dimensions (small, synthetic) -----------------------------------
B = 2            # batch
S = 8            # sequence length
BS = B * S       # flattened tokens
H = 32           # hidden size
NH = 4           # attention heads
HD = H // NH     # head dim
FF = 64          # feed-forward dim
V = 50           # vocab size

LANES = 128

# ---- packed bias / LN / regressor table layout (f32, one (16,128) tile) ----
(ROW_BQKV, ROW_BO, ROW_LN1G, ROW_LN1B, ROW_B1, ROW_B2,
 ROW_LN2G, ROW_LN2B, ROW_WR, ROW_BR) = range(10)
BIAS_ROWS = 16

# ---- packed bf16 selector table layout (tile-aligned row offsets) ----------
SEL_ROW = 0                                   # (H, NH)  head selector
SELT_ROW = ((H + 15) // 16) * 16              # (NH, H)  head expander
CLSPICK_ROW = SELT_ROW + ((NH + 15) // 16) * 16   # (B, BS) CLS-row picker
SELTAB_ROWS = CLSPICK_ROW + ((B + 15) // 16) * 16

# ---- packed f32 segment table layout ---------------------------------------
BCAST_ROW = 0          # (BS, BS) broadcast each block's CLS row to all rows
SEG_ROW = BS           # (BS, BS) block-diagonal ones (per-block sum)
CLSSEG_ROW = 2 * BS    # (B, BS)  per-block reduction to stacked CLS rows
SEGTAB_ROWS = 2 * BS + ((B + 7) // 8) * 8


def _layer_norm(x, gamma, beta, eps=1e-12):
    # Fused single-pass LN; variance clamped at 0 to avoid rsqrt(negative)
    # from E[x^2] - E[x]^2 cancellation.
    n = x.shape[-1]
    s1 = jnp.sum(x, axis=-1, keepdims=True)
    s2 = jnp.sum(x * x, axis=-1, keepdims=True)
    mu = s1 * (1.0 / n)
    var = jnp.maximum(s2 * (1.0 / n) - mu * mu, 0.0)
    return (x - mu) * jax.lax.rsqrt(var + eps) * gamma + beta


def molformer_regressor_kernel(x_ref, mask_ref, wqkv_ref, wo_ref, w1_ref,
                               w2_ref, seltab_ref, segtab_ref, bias_ref,
                               out_ref):
    x = x_ref[...]                                  # (BS, H) bf16 token embeddings
    mask = mask_ref[...]                            # (BS, 1) f32 in {0, 1}
    attn_bias = (mask - 1.0) * 1e9                  # 0 attended, -1e9 masked

    # ---- constant tables (static, tile-aligned slices) ----
    sel = seltab_ref[SEL_ROW:SEL_ROW + H, 0:NH]                 # (H, NH) bf16
    selt = seltab_ref[SELT_ROW:SELT_ROW + NH, 0:H]              # (NH, H) bf16
    cls_pick = seltab_ref[CLSPICK_ROW:CLSPICK_ROW + B, 0:BS]    # (B, BS) bf16
    bcast = segtab_ref[BCAST_ROW:BCAST_ROW + BS, 0:BS]          # (BS, BS) f32
    seg = segtab_ref[SEG_ROW:SEG_ROW + BS, 0:BS]                # (BS, BS) f32
    cls_seg = segtab_ref[CLSSEG_ROW:CLSSEG_ROW + B, 0:BS]       # (B, BS) f32

    # ---- fused Q/K/V projection over the whole (B*S) slab (bf16 MXU, f32 acc)
    qkv = jnp.dot(x, wqkv_ref[...], preferred_element_type=jnp.float32)
    qkv = qkv + bias_ref[ROW_BQKV:ROW_BQKV + 1, 0:3 * H]        # (BS, 3H)
    q = qkv[:, 0:H]
    k = qkv[:, H:2 * H]
    v = qkv[:, 2 * H:3 * H]

    # Broadcast each block's CLS query to all of its key rows (exact 0/1 matmul).
    q_bcast = jnp.dot(bcast, q, preferred_element_type=jnp.float32)   # (BS, H)

    # Per-head scores via the head-selector matmul (no head loop / lane concat).
    scale = 1.0 / (HD ** 0.5)
    prod = (k * q_bcast).astype(jnp.bfloat16)                         # (BS, H)
    scores = jnp.dot(prod, sel, preferred_element_type=jnp.float32) * scale
    scores = scores + attn_bias                                       # (BS, NH)

    # Softmax over keys within each batch block.  A single global max is used:
    # the exp(m_block - m_global) factor cancels after normalization, so this
    # is exact while avoiding a segmented max.
    m = jnp.max(scores, axis=0, keepdims=True)                        # (1, NH)
    e = jnp.exp(scores - m)                                           # (BS, NH)
    denom = jnp.dot(seg, e, preferred_element_type=jnp.float32)       # per-block sums
    denom = jnp.maximum(denom, 1e-30)          # guard fully-masked rows
    p = e * pl.reciprocal(denom, approx=True)                         # (BS, NH)

    # Expand head probs back over hidden lanes, weight values, reduce per block.
    p_full = jnp.dot(p.astype(jnp.bfloat16), selt,
                     preferred_element_type=jnp.float32)              # (BS, H)
    ctx = jnp.dot(cls_seg, p_full * v,
                  preferred_element_type=jnp.float32)                 # (B, H)

    attn_out = jnp.dot(ctx.astype(jnp.bfloat16), wo_ref[...],
                       preferred_element_type=jnp.float32)
    attn_out = attn_out + bias_ref[ROW_BO:ROW_BO + 1, 0:H]            # (B, H)

    # Residual uses the CLS token embeddings (exact 0/1 pick of bf16 rows,
    # upcast to f32 by the accumulator).
    x_cls = jnp.dot(cls_pick, x, preferred_element_type=jnp.float32)  # (B, H)

    h1 = _layer_norm(x_cls + attn_out,
                     bias_ref[ROW_LN1G:ROW_LN1G + 1, 0:H],
                     bias_ref[ROW_LN1B:ROW_LN1B + 1, 0:H])

    # ---- feed-forward (stacked CLS rows only) ----
    ff = jnp.dot(h1.astype(jnp.bfloat16), w1_ref[...],
                 preferred_element_type=jnp.float32)
    ff = ff + bias_ref[ROW_B1:ROW_B1 + 1, 0:FF]
    # TODO(synk): HF MolFormer default GELU is the exact erf form; the tanh
    # approximation is used here (differs at ~1e-3).
    ff = jax.nn.gelu(ff, approximate=True)
    ff = jnp.dot(ff.astype(jnp.bfloat16), w2_ref[...],
                 preferred_element_type=jnp.float32)
    ff = ff + bias_ref[ROW_B2:ROW_B2 + 1, 0:H]

    h2 = _layer_norm(h1 + ff,
                     bias_ref[ROW_LN2G:ROW_LN2G + 1, 0:H],
                     bias_ref[ROW_LN2B:ROW_LN2B + 1, 0:H])             # (B, H)

    # dropout(p=0.1): eval-mode identity.
    # ---- regressor Linear(H, 1) as VPU multiply + lane reduce ----
    wr = bias_ref[ROW_WR:ROW_WR + 1, 0:H]
    br = bias_ref[ROW_BR:ROW_BR + 1, 0:1]
    logit = jnp.sum(h2 * wr, axis=-1, keepdims=True) + br              # (B, 1)

    # One lane-dense store for all B logits; wrapper reads column 0.
    out_ref[...] = jnp.broadcast_to(logit, out_ref.shape)              # (B, 128)


def init_params(key):
    ks = jax.random.split(key, 8)
    std = 0.02
    embed = (jax.random.normal(ks[0], (V, H), jnp.float32) * std).astype(jnp.bfloat16)
    wq = jax.random.normal(ks[1], (H, H), jnp.float32) * std
    wk = jax.random.normal(ks[2], (H, H), jnp.float32) * std
    wv = jax.random.normal(ks[3], (H, H), jnp.float32) * std
    wo = jax.random.normal(ks[4], (H, H), jnp.float32) * std
    w1 = jax.random.normal(ks[5], (H, FF), jnp.float32) * std
    w2 = jax.random.normal(ks[6], (FF, H), jnp.float32) * std
    wr = jax.random.normal(ks[7], (H,), jnp.float32) * std

    wqkv = jnp.concatenate([wq, wk, wv], axis=1).astype(jnp.bfloat16)   # (H, 3H)

    # --- bf16 selector table: head selector / expander + CLS-row picker ---
    head_sel = (jnp.arange(H)[:, None] // HD
                == jnp.arange(NH)[None, :]).astype(jnp.float32)         # (H, NH)
    cls_pick = (jnp.arange(BS)[None, :]
                == (jnp.arange(B) * S)[:, None]).astype(jnp.float32)    # (B, BS)
    seltab = jnp.zeros((SELTAB_ROWS, H), jnp.float32)
    seltab = seltab.at[SEL_ROW:SEL_ROW + H, 0:NH].set(head_sel)
    seltab = seltab.at[SELT_ROW:SELT_ROW + NH, 0:H].set(head_sel.T)
    seltab = seltab.at[CLSPICK_ROW:CLSPICK_ROW + B, 0:BS].set(cls_pick)
    seltab = seltab.astype(jnp.bfloat16)

    # --- f32 segment table: per-block broadcast / sum matrices ---
    blk = jnp.arange(BS) // S
    bcast_mat = (jnp.arange(BS)[None, :] == (blk * S)[:, None]).astype(jnp.float32)
    seg_mat = (blk[:, None] == blk[None, :]).astype(jnp.float32)
    cls_seg = (jnp.arange(B)[:, None] == blk[None, :]).astype(jnp.float32)
    segtab = jnp.zeros((SEGTAB_ROWS, BS), jnp.float32)
    segtab = segtab.at[BCAST_ROW:BCAST_ROW + BS, :].set(bcast_mat)
    segtab = segtab.at[SEG_ROW:SEG_ROW + BS, :].set(seg_mat)
    segtab = segtab.at[CLSSEG_ROW:CLSSEG_ROW + B, :].set(cls_seg)

    # --- packed bias / LN / regressor table (one f32 (16,128) tile) ---
    biastab = jnp.zeros((BIAS_ROWS, LANES), jnp.float32)
    biastab = biastab.at[ROW_LN1G, 0:H].set(1.0)     # LN gammas init to 1
    biastab = biastab.at[ROW_LN2G, 0:H].set(1.0)
    biastab = biastab.at[ROW_WR, 0:H].set(wr)        # regressor weight row
    # ROW_BQKV / ROW_BO / ROW_LN1B / ROW_B1 / ROW_B2 / ROW_LN2B / ROW_BR = 0.

    return {
        'embed': embed,
        'wqkv': wqkv,
        'wo': wo.astype(jnp.bfloat16),
        'w1': w1.astype(jnp.bfloat16),
        'w2': w2.astype(jnp.bfloat16),
        'seltab': seltab,
        'segtab': segtab,
        'biastab': biastab,
    }


@jax.jit
def molformer_regressor(input_ids, attention_mask, params):
    # TODO(synk): at real MolFormer scale, fuse this gather into the kernel
    # (PrefetchScalarGridSpec + pl.Element row gather) to avoid an HBM round
    # trip of the (B, S, H) activation; negligible at B=2 / S=8.
    emb = jnp.take(params['embed'], input_ids, axis=0)              # (B,S,H) bf16
    x2 = emb.reshape(BS, H)                                         # (BS, H) bf16
    mask2 = attention_mask.astype(jnp.float32).reshape(BS, 1)       # (BS, 1) f32

    # Single invocation, no grid: every operand lives whole in VMEM and all
    # matmuls run at M = B or M = B*S instead of M = 1 per grid step.
    out = pl.pallas_call(
        molformer_regressor_kernel,
        out_shape=jax.ShapeDtypeStruct((B, LANES), jnp.float32),
    )(x2, mask2, params['wqkv'], params['wo'], params['w1'], params['w2'],
      params['seltab'], params['segtab'], params['biastab'])

    return out[:, :1]                                               # (B, 1)


if __name__ == "__main__":
    key = jax.random.PRNGKey(0)
    k_param, k_ids = jax.random.split(key, 2)

    params = init_params(k_param)
    input_ids = jax.random.randint(k_ids, (B, S), 0, V, dtype=jnp.int32)
    # attention mask: first row fully attended, second row has 2 padded tokens.
    attention_mask = jnp.array(
        [[1] * S, [1] * (S - 2) + [0, 0]], dtype=jnp.int32)

    out = molformer_regressor(input_ids, attention_mask, params)
    out = jax.block_until_ready(out)
    assert out.shape == (B, 1) and out.dtype == jnp.float32
    assert bool(jnp.all(jnp.isfinite(out)))
    print("KERNEL_OK")
</pallas_src>

<mosaic_0001>
module attributes {stable_mosaic.version = 11 : i64} {
  func.func @molformer_regressor_kernel(%arg0: memref<16x32xbf16, #tpu.memory_space<vmem>>, %arg1: memref<16x1xf32, #tpu.memory_space<vmem>>, %arg2: memref<32x96xbf16, #tpu.memory_space<vmem>>, %arg3: memref<32x32xbf16, #tpu.memory_space<vmem>>, %arg4: memref<32x64xbf16, #tpu.memory_space<vmem>>, %arg5: memref<64x32xbf16, #tpu.memory_space<vmem>>, %arg6: memref<64x32xbf16, #tpu.memory_space<vmem>>, %arg7: memref<40x16xf32, #tpu.memory_space<vmem>>, %arg8: memref<16x128xf32, #tpu.memory_space<vmem>>, %arg9: memref<2x128xf32, #tpu.memory_space<vmem>>) attributes {dimension_semantics = [], scalar_prefetch = 0 : i64, scratch_operands = 0 : i64, tpu.core_type = #tpu.core_type<tc>} {
    %c0 = arith.constant 0 : index
    %c0_0 = arith.constant 0 : index
    %0 = vector.load %arg0[%c0, %c0_0] : memref<16x32xbf16, #tpu.memory_space<vmem>>, vector<16x32xbf16>
    %c0_1 = arith.constant 0 : index
    %c0_2 = arith.constant 0 : index
    %1 = vector.load %arg1[%c0_1, %c0_2] : memref<16x1xf32, #tpu.memory_space<vmem>>, vector<16x1xf32>
    %cst = arith.constant 1.000000e+00 : f32
    %2 = vector.broadcast %cst : f32 to vector<16x1xf32>
    %3 = arith.subf %1, %2 : vector<16x1xf32>
    %cst_3 = arith.constant 1.000000e+09 : f32
    %4 = vector.broadcast %cst_3 : f32 to vector<16x1xf32>
    %5 = arith.mulf %3, %4 : vector<16x1xf32>
    %c0_4 = arith.constant 0 : index
    %c0_5 = arith.constant 0 : index
    %6 = vector.load %arg6[%c0_4, %c0_5] : memref<64x32xbf16, #tpu.memory_space<vmem>>, vector<32x4xbf16>
    %c32 = arith.constant 32 : index
    %c0_6 = arith.constant 0 : index
    %7 = vector.load %arg6[%c32, %c0_6] : memref<64x32xbf16, #tpu.memory_space<vmem>>, vector<4x32xbf16>
    %c48 = arith.constant 48 : index
    %c0_7 = arith.constant 0 : index
    %8 = vector.load %arg6[%c48, %c0_7] : memref<64x32xbf16, #tpu.memory_space<vmem>>, vector<2x16xbf16>
    %c0_8 = arith.constant 0 : index
    %c0_9 = arith.constant 0 : index
    %9 = vector.load %arg7[%c0_8, %c0_9] : memref<40x16xf32, #tpu.memory_space<vmem>>, vector<16x16xf32>
    %c16 = arith.constant 16 : index
    %c0_10 = arith.constant 0 : index
    %10 = vector.load %arg7[%c16, %c0_10] : memref<40x16xf32, #tpu.memory_space<vmem>>, vector<16x16xf32>
    %c32_11 = arith.constant 32 : index
    %c0_12 = arith.constant 0 : index
    %11 = vector.load %arg7[%c32_11, %c0_12] : memref<40x16xf32, #tpu.memory_space<vmem>>, vector<2x16xf32>
    %c0_13 = arith.constant 0 : index
    %c0_14 = arith.constant 0 : index
    %12 = vector.load %arg2[%c0_13, %c0_14] : memref<32x96xbf16, #tpu.memory_space<vmem>>, vector<32x96xbf16>
    %cst_15 = arith.constant dense<0.000000e+00> : vector<16x96xf32>
    %13 = tpu.matmul %0, %12, %cst_15 {dimension_numbers = #tpu.dot_dimension_numbers<[1], [0], [0], [1], [0, 0, 1, 1], [], []>} : vector<16x32xbf16>, vector<32x96xbf16>, vector<16x96xf32> -> vector<16x96xf32>
    %c0_16 = arith.constant 0 : index
    %c0_17 = arith.constant 0 : index
    %14 = vector.load %arg8[%c0_16, %c0_17] : memref<16x128xf32, #tpu.memory_space<vmem>>, vector<1x96xf32>
    %15 = vector.broadcast %14 : vector<1x96xf32> to vector<16x96xf32>
    %16 = arith.addf %13, %15 : vector<16x96xf32>
    %17 = vector.extract_strided_slice %16 {offsets = [0, 0], sizes = [16, 32], strides = [1, 1]} : vector<16x96xf32> to vector<16x32xf32>
    %18 = vector.extract_strided_slice %16 {offsets = [0, 32], sizes = [16, 32], strides = [1, 1]} : vector<16x96xf32> to vector<16x32xf32>
    %19 = vector.extract_strided_slice %16 {offsets = [0, 64], sizes = [16, 32], strides = [1, 1]} : vector<16x96xf32> to vector<16x32xf32>
    %cst_18 = arith.constant dense<0.000000e+00> : vector<16x32xf32>
    %20 = tpu.matmul %9, %17, %cst_18 {dimension_numbers = #tpu.dot_dimension_numbers<[1], [0], [0], [1], [0, 0, 1, 1], [], []>} : vector<16x16xf32>, vector<16x32xf32>, vector<16x32xf32> -> vector<16x32xf32>
    %21 = arith.mulf %18, %20 : vector<16x32xf32>
    %22 = arith.truncf %21 : vector<16x32xf32> to vector<16x32xbf16>
    %cst_19 = arith.constant dense<0.000000e+00> : vector<16x4xf32>
    %23 = tpu.matmul %22, %6, %cst_19 {dimension_numbers = #tpu.dot_dimension_numbers<[1], [0], [0], [1], [0, 0, 1, 1], [], []>} : vector<16x32xbf16>, vector<32x4xbf16>, vector<16x4xf32> -> vector<16x4xf32>
    %cst_20 = arith.constant 0.353553385 : f32
    %24 = vector.broadcast %cst_20 : f32 to vector<16x4xf32>
    %25 = arith.mulf %23, %24 : vector<16x4xf32>
    %26 = vector.broadcast %5 : vector<16x1xf32> to vector<16x4xf32>
    %27 = arith.addf %25, %26 : vector<16x4xf32>
    %cst_21 = arith.constant dense<0xFF800000> : vector<4xf32>
    %28 = vector.multi_reduction <maximumf>, %27, %cst_21 [0] : vector<16x4xf32> to vector<4xf32>
    %29 = vector.shape_cast %28 : vector<4xf32> to vector<1x4xf32>
    %30 = vector.broadcast %29 : vector<1x4xf32> to vector<16x4xf32>
    %31 = arith.subf %27, %30 : vector<16x4xf32>
    %32 = math.exp %31 : vector<16x4xf32>
    %cst_22 = arith.constant dense<0.000000e+00> : vector<16x4xf32>
    %33 = tpu.matmul %10, %32, %cst_22 {dimension_numbers = #tpu.dot_dimension_numbers<[1], [0], [0], [1], [0, 0, 1, 1], [], []>} : vector<16x16xf32>, vector<16x4xf32>, vector<16x4xf32> -> vector<16x4xf32>
    %cst_23 = arith.constant 1.000000e-30 : f32
    %34 = vector.broadcast %cst_23 : f32 to vector<16x4xf32>
    %35 = arith.maximumf %33, %34 : vector<16x4xf32>
    %36 = tpu.reciprocal %35 {approx = true} : vector<16x4xf32> -> vector<16x4xf32>
    %37 = arith.mulf %32, %36 : vector<16x4xf32>
    %38 = arith.truncf %37 : vector<16x4xf32> to vector<16x4xbf16>
    %cst_24 = arith.constant dense<0.000000e+00> : vector<16x32xf32>
    %39 = tpu.matmul %38, %7, %cst_24 {dimension_numbers = #tpu.dot_dimension_numbers<[1], [0], [0], [1], [0, 0, 1, 1], [], []>} : vector<16x4xbf16>, vector<4x32xbf16>, vector<16x32xf32> -> vector<16x32xf32>
    %40 = arith.mulf %39, %19 : vector<16x32xf32>
    %cst_25 = arith.constant dense<0.000000e+00> : vector<2x32xf32>
    %41 = tpu.matmul %11, %40, %cst_25 {dimension_numbers = #tpu.dot_dimension_numbers<[1], [0], [0], [1], [0, 0, 1, 1], [], []>} : vector<2x16xf32>, vector<16x32xf32>, vector<2x32xf32> -> vector<2x32xf32>
    %42 = arith.truncf %41 : vector<2x32xf32> to vector<2x32xbf16>
    %c0_26 = arith.constant 0 : index
    %c0_27 = arith.constant 0 : index
    %43 = vector.load %arg3[%c0_26, %c0_27] : memref<32x32xbf16, #tpu.memory_space<vmem>>, vector<32x32xbf16>
    %cst_28 = arith.constant dense<0.000000e+00> : vector<2x32xf32>
    %44 = tpu.matmul %42, %43, %cst_28 {dimension_numbers = #tpu.dot_dimension_numbers<[1], [0], [0], [1], [0, 0, 1, 1], [], []>} : vector<2x32xbf16>, vector<32x32xbf16>, vector<2x32xf32> -> vector<2x32xf32>
    %c1 = arith.constant 1 : index
    %c0_29 = arith.constant 0 : index
    %45 = vector.load %arg8[%c1, %c0_29] : memref<16x128xf32, #tpu.memory_space<vmem>>, vector<1x32xf32>
    %46 = vector.broadcast %45 : vector<1x32xf32> to vector<2x32xf32>
    %47 = arith.addf %44, %46 : vector<2x32xf32>
    %cst_30 = arith.constant dense<0.000000e+00> : vector<2x32xf32>
    %48 = tpu.matmul %8, %0, %cst_30 {dimension_numbers = #tpu.dot_dimension_numbers<[1], [0], [0], [1], [0, 0, 1, 1], [], []>} : vector<2x16xbf16>, vector<16x32xbf16>, vector<2x32xf32> -> vector<2x32xf32>
    %49 = arith.addf %48, %47 : vector<2x32xf32>
    %c2 = arith.constant 2 : index
    %c0_31 = arith.constant 0 : index
    %50 = vector.load %arg8[%c2, %c0_31] : memref<16x128xf32, #tpu.memory_space<vmem>>, vector<1x32xf32>
    %c3 = arith.constant 3 : index
    %c0_32 = arith.constant 0 : index
    %51 = vector.load %arg8[%c3, %c0_32] : memref<16x128xf32, #tpu.memory_space<vmem>>, vector<1x32xf32>
    %cst_33 = arith.constant dense<0.000000e+00> : vector<2xf32>
    %52 = vector.multi_reduction <add>, %49, %cst_33 [1] : vector<2x32xf32> to vector<2xf32>
    %53 = vector.shape_cast %52 : vector<2xf32> to vector<2x1xf32>
    %54 = arith.mulf %49, %49 : vector<2x32xf32>
    %cst_34 = arith.constant dense<0.000000e+00> : vector<2xf32>
    %55 = vector.multi_reduction <add>, %54, %cst_34 [1] : vector<2x32xf32> to vector<2xf32>
    %56 = vector.shape_cast %55 : vector<2xf32> to vector<2x1xf32>
    %cst_35 = arith.constant 3.125000e-02 : f32
    %57 = vector.broadcast %cst_35 : f32 to vector<2x1xf32>
    %58 = arith.mulf %53, %57 : vector<2x1xf32>
    %cst_36 = arith.constant 3.125000e-02 : f32
    %59 = vector.broadcast %cst_36 : f32 to vector<2x1xf32>
    %60 = arith.mulf %56, %59 : vector<2x1xf32>
    %61 = arith.mulf %58, %58 : vector<2x1xf32>
    %62 = arith.subf %60, %61 : vector<2x1xf32>
    %cst_37 = arith.constant 0.000000e+00 : f32
    %63 = vector.broadcast %cst_37 : f32 to vector<2x1xf32>
    %64 = arith.maximumf %62, %63 : vector<2x1xf32>
    %65 = vector.broadcast %58 : vector<2x1xf32> to vector<2x32xf32>
    %66 = arith.subf %49, %65 : vector<2x32xf32>
    %cst_38 = arith.constant 9.99999996E-13 : f32
    %67 = vector.broadcast %cst_38 : f32 to vector<2x1xf32>
    %68 = arith.addf %64, %67 : vector<2x1xf32>
    %69 = math.rsqrt %68 : vector<2x1xf32>
    %70 = vector.broadcast %69 : vector<2x1xf32> to vector<2x32xf32>
    %71 = arith.mulf %66, %70 : vector<2x32xf32>
    %72 = vector.broadcast %50 : vector<1x32xf32> to vector<2x32xf32>
    %73 = arith.mulf %71, %72 : vector<2x32xf32>
    %74 = vector.broadcast %51 : vector<1x32xf32> to vector<2x32xf32>
    %75 = arith.addf %73, %74 : vector<2x32xf32>
    %76 = arith.truncf %75 : vector<2x32xf32> to vector<2x32xbf16>
    %c0_39 = arith.constant 0 : index
    %c0_40 = arith.constant 0 : index
    %77 = vector.load %arg4[%c0_39, %c0_40] : memref<32x64xbf16, #tpu.memory_space<vmem>>, vector<32x64xbf16>
    %cst_41 = arith.constant dense<0.000000e+00> : vector<2x64xf32>
    %78 = tpu.matmul %76, %77, %cst_41 {dimension_numbers = #tpu.dot_dimension_numbers<[1], [0], [0], [1], [0, 0, 1, 1], [], []>} : vector<2x32xbf16>, vector<32x64xbf16>, vector<2x64xf32> -> vector<2x64xf32>
    %c4 = arith.constant 4 : index
    %c0_42 = arith.constant 0 : index
    %79 = vector.load %arg8[%c4, %c0_42] : memref<16x128xf32, #tpu.memory_space<vmem>>, vector<1x64xf32>
    %80 = vector.broadcast %79 : vector<1x64xf32> to vector<2x64xf32>
    %81 = arith.addf %78, %80 : vector<2x64xf32>
    %82 = arith.mulf %81, %81 : vector<2x64xf32>
    %83 = arith.mulf %81, %82 : vector<2x64xf32>
    %cst_43 = arith.constant 4.471500e-02 : f32
    %84 = vector.broadcast %cst_43 : f32 to vector<2x64xf32>
    %85 = arith.mulf %84, %83 : vector<2x64xf32>
    %86 = arith.addf %81, %85 : vector<2x64xf32>
    %cst_44 = arith.constant 0.797884583 : f32
    %87 = vector.broadcast %cst_44 : f32 to vector<2x64xf32>
    %88 = arith.mulf %87, %86 : vector<2x64xf32>
    %89 = math.tanh %88 : vector<2x64xf32>
    %cst_45 = arith.constant 1.000000e+00 : f32
    %90 = vector.broadcast %cst_45 : f32 to vector<2x64xf32>
    %91 = arith.addf %90, %89 : vector<2x64xf32>
    %cst_46 = arith.constant 5.000000e-01 : f32
    %92 = vector.broadcast %cst_46 : f32 to vector<2x64xf32>
    %93 = arith.mulf %92, %91 : vector<2x64xf32>
    %94 = arith.mulf %81, %93 : vector<2x64xf32>
    %95 = arith.truncf %94 : vector<2x64xf32> to vector<2x64xbf16>
    %c0_47 = arith.constant 0 : index
    %c0_48 = arith.constant 0 : index
    %96 = vector.load %arg5[%c0_47, %c0_48] : memref<64x32xbf16, #tpu.memory_space<vmem>>, vector<64x32xbf16>
    %cst_49 = arith.constant dense<0.000000e+00> : vector<2x32xf32>
    %97 = tpu.matmul %95, %96, %cst_49 {dimension_numbers = #tpu.dot_dimension_numbers<[1], [0], [0], [1], [0, 0, 1, 1], [], []>} : vector<2x64xbf16>, vector<64x32xbf16>, vector<2x32xf32> -> vector<2x32xf32>
    %c5 = arith.constant 5 : index
    %c0_50 = arith.constant 0 : index
    %98 = vector.load %arg8[%c5, %c0_50] : memref<16x128xf32, #tpu.memory_space<vmem>>, vector<1x32xf32>
    %99 = vector.broadcast %98 : vector<1x32xf32> to vector<2x32xf32>
    %100 = arith.addf %97, %99 : vector<2x32xf32>
    %101 = arith.addf %75, %100 : vector<2x32xf32>
    %c6 = arith.constant 6 : index
    %c0_51 = arith.constant 0 : index
    %102 = vector.load %arg8[%c6, %c0_51] : memref<16x128xf32, #tpu.memory_space<vmem>>, vector<1x32xf32>
    %c7 = arith.constant 7 : index
    %c0_52 = arith.constant 0 : index
    %103 = vector.load %arg8[%c7, %c0_52] : memref<16x128xf32, #tpu.memory_space<vmem>>, vector<1x32xf32>
    %cst_53 = arith.constant dense<0.000000e+00> : vector<2xf32>
    %104 = vector.multi_reduction <add>, %101, %cst_53 [1] : vector<2x32xf32> to vector<2xf32>
    %105 = vector.shape_cast %104 : vector<2xf32> to vector<2x1xf32>
    %106 = arith.mulf %101, %101 : vector<2x32xf32>
    %cst_54 = arith.constant dense<0.000000e+00> : vector<2xf32>
    %107 = vector.multi_reduction <add>, %106, %cst_54 [1] : vector<2x32xf32> to vector<2xf32>
    %108 = vector.shape_cast %107 : vector<2xf32> to vector<2x1xf32>
    %cst_55 = arith.constant 3.125000e-02 : f32
    %109 = vector.broadcast %cst_55 : f32 to vector<2x1xf32>
    %110 = arith.mulf %105, %109 : vector<2x1xf32>
    %cst_56 = arith.constant 3.125000e-02 : f32
    %111 = vector.broadcast %cst_56 : f32 to vector<2x1xf32>
    %112 = arith.mulf %108, %111 : vector<2x1xf32>
    %113 = arith.mulf %110, %110 : vector<2x1xf32>
    %114 = arith.subf %112, %113 : vector<2x1xf32>
    %cst_57 = arith.constant 0.000000e+00 : f32
    %115 = vector.broadcast %cst_57 : f32 to vector<2x1xf32>
    %116 = arith.maximumf %114, %115 : vector<2x1xf32>
    %117 = vector.broadcast %110 : vector<2x1xf32> to vector<2x32xf32>
    %118 = arith.subf %101, %117 : vector<2x32xf32>
    %cst_58 = arith.constant 9.99999996E-13 : f32
    %119 = vector.broadcast %cst_58 : f32 to vector<2x1xf32>
    %120 = arith.addf %116, %119 : vector<2x1xf32>
    %121 = math.rsqrt %120 : vector<2x1xf32>
    %122 = vector.broadcast %121 : vector<2x1xf32> to vector<2x32xf32>
    %123 = arith.mulf %118, %122 : vector<2x32xf32>
    %124 = vector.broadcast %102 : vector<1x32xf32> to vector<2x32xf32>
    %125 = arith.mulf %123, %124 : vector<2x32xf32>
    %126 = vector.broadcast %103 : vector<1x32xf32> to vector<2x32xf32>
    %127 = arith.addf %125, %126 : vector<2x32xf32>
    %c8 = arith.constant 8 : index
    %c0_59 = arith.constant 0 : index
    %128 = vector.load %arg8[%c8, %c0_59] : memref<16x128xf32, #tpu.memory_space<vmem>>, vector<1x32xf32>
    %c9 = arith.constant 9 : index
    %c0_60 = arith.constant 0 : index
    %129 = vector.load %arg8[%c9, %c0_60] : memref<16x128xf32, #tpu.memory_space<vmem>>, vector<1x1xf32>
    %130 = vector.broadcast %128 : vector<1x32xf32> to vector<2x32xf32>
    %131 = arith.mulf %127, %130 : vector<2x32xf32>
    %cst_61 = arith.constant dense<0.000000e+00> : vector<2xf32>
    %132 = vector.multi_reduction <add>, %131, %cst_61 [1] : vector<2x32xf32> to vector<2xf32>
    %133 = vector.shape_cast %132 : vector<2xf32> to vector<2x1xf32>
    %134 = vector.broadcast %129 : vector<1x1xf32> to vector<2x1xf32>
    %135 = arith.addf %133, %134 : vector<2x1xf32>
    %136 = vector.shape_cast %135 : vector<2x1xf32> to vector<2x1xf32>
    %137 = vector.broadcast %136 : vector<2x1xf32> to vector<2x128xf32>
    %c0_62 = arith.constant 0 : index
    %c0_63 = arith.constant 0 : index
    %138 = vector.load %arg9[%c0_62, %c0_63] : memref<2x128xf32, #tpu.memory_space<vmem>>, vector<2x128xf32>
    tpu.vector_store %arg9[%c0_62, %c0_63], %137 {strides = array<i32>} : memref<2x128xf32, #tpu.memory_space<vmem>>, vector<2x128xf32>,
    return
  }
}

</mosaic_0001>

<bundles_post_ra>
// kernel: molformer_regressor.1
= control target key start
LH: loop header
LB: loop body
LE: loop exit
PB: predicated region body
PF: predicated region fallthrough
CT: control target
= control target key end

     0   :  { %v1070_v0 = vmov 0.0   ;;  %vm1071_vm0 = vmmov 0   ;;  %vm78_vm1 = vcmask 261120   ;;  %vm123_vm2 = vcmask 130048   ;;  %s1073_s19 = smov 32   ;;  %s1074_s26 = smov 96   ;;  %s1278_s2 = inlined_call_operand.vmem [shape: bf16[32,96], index: 2, kind: input, shape index: {}]   ;;  %s1279_s0 = inlined_call_operand.vmem [shape: bf16[16,32], index: 0, kind: input, shape index: {}]   ;;  %s1280_s7 = inlined_call_operand.vmem [shape: f32[40,16], index: 7, kind: input, shape index: {}]   ;;  %s1281_s8 = inlined_call_operand.vmem [shape: f32[16,128], index: 8, kind: input, shape index: {}]   ;;  %s1282_s6 = inlined_call_operand.vmem [shape: bf16[64,32], index: 6, kind: input, shape index: {}]   ;;  %s1283_s1 = inlined_call_operand.vmem [shape: f32[16,1], index: 1, kind: input, shape index: {}]   ;;  %s1284_s3 = inlined_call_operand.vmem [shape: bf16[32,32], index: 3, kind: input, shape index: {}]   ;;  %s1285_s4 = inlined_call_operand.vmem [shape: bf16[32,64], index: 4, kind: input, shape index: {}]   ;;  %s1286_s5 = inlined_call_operand.vmem [shape: bf16[64,32], index: 5, kind: input, shape index: {}]   ;;  %s1287_s9 = inlined_call_operand.vmem [shape: f32[2,128], index: 9, kind: output, shape index: {}]  }
   0x1   :  { %941 = vmatprep.subr.bf16.mxu0 %v1070_v0  ;;  %v1043_v1 = vld [vmem:[%s1278_s2] sm:$0xff]   ;;  %945 = vmatprep.mubr.msk.bf16.mxu0 %vm1071_vm0, %v1070_v0  ;;  %v1044_v2 = vld [vmem:[%s1278_s2 + $0x8] sm:$0xff]   ;;  %v1072_v14 = vmov 0   ;;  %s1075_s27 = smov 64   ;;  %v49_v31 = vld [vmem:[%s1280_s7 + $0x10] sm:$0xff]  ;;  %vm289_vm3 = vcmask 31744  }
   0x2   :  { %956 = vmatprep.subr.bf16.mxu1 %v1070_v0  ;;  %960 = vmatprep.mubr.msk.bf16.mxu1 %vm1071_vm0, %v1070_v0  ;;  %v1143_v3 = vld [vmem:[%s1279_s0] sm:$0xff]   ;;  %v48_v13 = vld [vmem:[%s1280_s7 + $0x8] sm:$0xff]  ;;  %v50_v58 = vld [vmem:[%s1280_s7 + $0x18] sm:$0xff]  ;;  %vm396_vm4 = vcmask 1041408   ;;  %vm635_vm5 = vcmask 254976   ;;  %vm774_vm6 = vcmask 523264  }
   0x3   :  { %942 = vmatpush3.bf16.msra.mxu0 %v1043_v1  ;;  %v47_v4 = vld [vmem:[%s1280_s7] sm:$0xff]  ;;  %1041 = vset.pattern.permute.xlu1 %v1072_v14  ;;  %v1047_v18 = vld [vmem:[%s1282_s6 + $0x8] sm:$0xff]   ;;  %v45_v59 = vld [vmem:[%s1282_s6 + $0x10] sm:$0x3] }
   0x4   :  { %943 = vmatprep.subr.bf16.mxu0 %v1070_v0  ;;  %v874_v5 = vld [vmem:[%s1281_s8] ss:$0 sm:$0xff]  ;;  %1042 = vset.pattern.permute.xlu0 %v1072_v14  ;;  %v36_v27 = vld [vmem:[%s1283_s1 + $0x8] sm:$0xff]  ;;  %v398_v60 = vsel %vm396_vm4, %v45_v59, 0 }
   0x5   :  { %v1046_v17 = vld [vmem:[%s1282_s6] sm:$0xff]   ;;  %v873_v28 = vadd.f32 -1.0, %v36_v27 }
   0x6   :  { %957 = vmatpush3.bf16.msra.mxu1 %v1046_v17  ;;  %v35_v20 = vld [vmem:[%s1283_s1] sm:$0xff] }
   0x7   :  { %944 = vmatpush3.bf16.msra.mxu0 %v1044_v2  ;;  %958 = vmatprep.subr.bf16.mxu1 %v1070_v0  ;;  %v872_v24 = vadd.f32 -1.0, %v35_v20  ;;  %v40_v29 = vmul.f32 1e+09, %v873_v28  ;;  %v1049_v20 = vld [vmem:[%s1284_s3 + $0x8] sm:$0xff]  }
   0x9   :  { %v39_v26 = vmul.f32 1e+09, %v872_v24  ;;  %v46_v24 = vld [vmem:[%s1282_s6 + $0x18] sm:$0x1] }
   0xa   :  { %946 = vmatmul.mubr.msk.bf16.vlgmr.msra.gmra.mrb[0].mxu0 %vm78_vm1, %v1143_v3  ;;  %959 = vmatpush3.bf16.msra.mxu1 %v1047_v18 }
   0xb   :  { %953 = vmatprep.mubr.msk.f32.mxu0 %vm123_vm2, %v47_v4 }
  0xdd   :  { %v116_v6 = vpop.f32.mrb[0].mxu0 }
  0xde   :  { %v947_v7 = vpop.f32.mrb[1].mxu0  ;;  %v117_v9 = vadd.f32 %v874_v5, %v116_v6 }
  0xdf   :  { %v119_v8 = vpop.f32.mrb[2].mxu0 }
  0xe0   :  { %v120_v10 = vadd.f32 %v874_v5, %v119_v8  ;;  %v948_v11 = vpop.f32.mrb[3].mxu0  ;;  %v1076_v8 = vmov 0.0|0.0  }
  0xe1   :  { %1026 = vmatprep.subr.bf16.mxu1 %v1076_v8  ;;  %v899_v8 = vld [vmem:[%s1281_s8 + $0x5] ss:$0 sm:$0xff] }
  0xe2   :  { %v1018_v12 = vpack.c.bf16 %v120_v10, %v117_v9 }
  0xe4   :  { %1019 = vmatprep.subr.bf16.mxu0 %v1018_v12 }
  0xe5   :  { %1021 = vmatpush3.bf16.msra.mxu0 %v1018_v12 }
  0xe8   :  { %954 = vmatmul.mubr.msk.f32.vlgmr.msra.gmra.mrb[4].mxu0 %vm123_vm2, %v48_v13 }
  0xe9   :  { %968 = vmatprep.mubr.msk.f32.mxu0 %vm123_vm2, %v49_v31 }
 0x1bb   :  { %v955_v15 = vpop.f32.mrb[4].mxu0 }
 0x1bc   :  { %v196_v16 = vpop.f32.mrb[5].mxu0 }
 0x1bd   :  { %207 = vrot.lane.b32.xlu0 %v196_v16, %s1073_s19 }
 0x1c1   :  { %209 = vrot.lane.b32.xlu0 %v955_v15, %s1073_s19 }
 0x1c5   :  { %284 = vperm.xlu0 %1042, %v40_v29  }
 0x22f   :  { %v208_v19 = vpop.permute.xlu0 %207 }
 0x230   :  { %v213_v22 = vmul.f32 %v208_v19, %v117_v9  ;;  %v51_v19 = vld [vmem:[%s1280_s7 + $0x20] sm:$0x3] }
 0x233   :  { %v210_v21 = vpop.permute.xlu0 %209 }
 0x234   :  { %v214_v23 = vmul.f32 %v210_v21, %v120_v10 }
 0x236   :  { %v215_v25 = vpack.c.bf16 %v214_v23, %v213_v22 }
 0x238   :  { %217 = vrot.lane.b32.xlu1 %v215_v25, %s1074_s26  ;;  %v888_v25 = vld [vmem:[%s1281_s8 + $0x1] ss:$0 sm:$0xff] }
 0x23c   :  { %279 = vperm.xlu1 %1041, %v39_v26  }
 0x240   :  { %443 = vrot.lane.b32.xlu1 %v117_v9, %s1075_s27  ;;  %v1048_v9 = vld [vmem:[%s1284_s3] sm:$0xff]  }
 0x244   :  { %445 = vrot.lane.b32.xlu1 %v120_v10, %s1075_s27  ;;  %v285_v37 = vpop.permute.xlu0 %284 }
 0x2aa   :  { %v218_v30 = vpop.permute.xlu1 %217 }
 0x2ab   :  { %961 = vmatmul.mubr.msk.bf16.vlgmr.msra.gmra.mrb[0].mxu1 %vm78_vm1, %v218_v30 }
 0x2ac   :  { %981 = vmatprep.mubr.msk.f32.mxu1 %vm1071_vm0, %v1070_v0 }
 0x2bb   :  { %v280_v33 = vpop.permute.xlu1 %279 }
 0x2bf   :  { %v444_v10 = vpop.permute.xlu1 %443 }
 0x2c3   :  { %v446_v13 = vpop.permute.xlu1 %445 }
 0x37e   :  { %v268_v32 = vpop.f32.mrb[0].mxu1 }
 0x37f   :  { %v275_v34 = vmul.f32 0.35355338, %v268_v32  ;;  %v962_v35 = vpop.f32.mrb[1].mxu1 }
 0x380   :  { %v271_v36 = vpop.f32.mrb[2].mxu1 }
 0x381   :  { %v287_v38 = vadd.f32 %v280_v33, %v275_v34  ;;  %v276_v39 = vmul.f32 0.35355338, %v271_v36  ;;  %v963_v40 = vpop.f32.mrb[3].mxu1  ;;  %v1050_v33 = vld [vmem:[%s1285_s4] sm:$0xff]   ;;  %v1051_v34 = vld [vmem:[%s1285_s4 + $0x8] sm:$0xff]  }
 0x383   :  { %v288_v41 = vadd.f32 %v285_v37, %v276_v39  ;;  %v290_v42 = vsel %vm289_vm3, %v287_v38, -inf }
 0x385   :  { %v291_v43 = vsel %vm289_vm3, %v288_v41, -inf }
 0x386   :  { %v292_v44 = vmax.f32 %v290_v42, %v291_v43 }
 0x388   :  { %v293_v45 = vrot.slane %v292_v44, 4 }
 0x38a   :  { %v294_v46 = vmax.f32 %v292_v44, %v293_v45  ;;  %v893_v45 = vld [vmem:[%s1281_s8 + $0x2] ss:$0 sm:$0xff] }
 0x38c   :  { %v295_v47 = vrot.slane %v294_v46, 2 }
 0x38e   :  { %v296_v48 = vmax.f32 %v294_v46, %v295_v47  ;;  %v894_v47 = vld [vmem:[%s1281_s8 + $0x3] ss:$0 sm:$0xff] }
 0x390   :  { %v297_v49 = vrot.slane %v296_v48, 1 }
 0x392   :  { %v298_v50 = vmax.f32 %v296_v48, %v297_v49 }
 0x394   :  { %v299_v51 = vsub.f32 %v287_v38, %v298_v50  ;;  %v300_v52 = vsub.f32 %v288_v41, %v298_v50 }
 0x396   :  { %v301_v53 = vmul.f32 1.442695, %v299_v51  ;;  %v303_v54 = vmul.f32 1.442695, %v300_v52  ;;  %v1052_v51 = vld [vmem:[%s1286_s5] sm:$0xff]   ;;  %v1053_v52 = vld [vmem:[%s1286_s5 + $0x8] sm:$0xff]  }
 0x398   :  { %1056 = vpow2.f32 %v301_v53  ;;  %v1054_v53 = vld [vmem:[%s1286_s5 + $0x10] sm:$0xff]  }
 0x399   :  { %1058 = vpow2.f32 %v303_v54  ;;  %v1055_v54 = vld [vmem:[%s1286_s5 + $0x18] sm:$0xff]  }
 0x3a2   :  { %v1057_v55 = vpop.eup %1056 }
 0x3a3   :  { %v1059_v56 = vpop.eup %1058 }
 0x3a4   :  { %v1022_v57 = vpack.c.bf16 %v1059_v56, %v1057_v55 }
 0x3a6   :  { %1023 = vmatprep.subr.bf16.mxu0 %v1022_v57 }
 0x3a7   :  { %1025 = vmatpush3.bf16.msra.mxu0 %v1022_v57 }
 0x3a8   :  { %971 = vmatprep.subr.bf16.mxu0 %v1070_v0 }
 0x3aa   :  { %969 = vmatmul.mubr.msk.f32.vlgmr.msra.gmra.mrb[6].mxu0 %vm123_vm2, %v50_v58 }
 0x3ab   :  { %973 = vmatprep.mubr.msk.bf16.mxu0 %vm1071_vm0, %v1070_v0  ;;  %972 = vmatpush3.bf16.msra.mxu0 %v398_v60 }
 0x3ac   :  { %984 = vmatprep.subr.bf16.mxu0 %v1070_v0 }
 0x47d   :  { %v970_v61 = vpop.f32.mrb[6].mxu0 }
 0x47e   :  { %v387_v62 = vmax.f32 %v970_v61, 1e-30  ;;  %v377_v63 = vpop.f32.mrb[7].mxu0 }
 0x47f   :  { %v386_v1 = vmax.f32 %v377_v63, 1e-30 }
 0x480   :  { %1060 = vrcp.f32 %v387_v62 }
 0x481   :  { %1062 = vrcp.f32 %v386_v1 }
 0x48a   :  { %v1061_v2 = vpop.eup %1060 }
 0x48b   :  { %v1063_v4 = vpop.eup %1062  ;;  %v391_v5 = vmul.f32 %v1061_v2, %v1059_v56 }
 0x48c   :  { %v390_v6 = vmul.f32 %v1063_v4, %v1057_v55  ;;  %v895_v55 = vld [vmem:[%s1281_s8 + $0x4] ss:$0 sm:$0xff] }
 0x48e   :  { %v392_v7 = vpack.c.bf16 %v391_v5, %v390_v6 }
 0x490   :  { %974 = vmatmul.mubr.msk.bf16.vlgmr.msra.gmra.mrb[8].mxu0 %vm289_vm3, %v392_v7 }
 0x491   :  { %988 = vmatprep.mubr.msk.bf16.mxu0 %vm1071_vm0, %v1070_v0  ;;  %985 = vmatpush3.bf16.msra.mxu0 %v1048_v9 }
 0x492   :  { %986 = vmatprep.subr.bf16.mxu0 %v1070_v0 }
 0x495   :  { %987 = vmatpush3.bf16.msra.mxu0 %v1049_v20 }
 0x496   :  { %992 = vmatprep.subr.bf16.mxu0 %v1070_v0 }
 0x563   :  { %v434_v11 = vpop.f32.mrb[8].mxu0 }
 0x564   :  { %v975_v12 = vpop.f32.mrb[9].mxu0  ;;  %v449_v15 = vmul.f32 %v444_v10, %v434_v11 }
 0x565   :  { %v437_v14 = vpop.f32.mrb[10].mxu0 }
 0x566   :  { %v450_v16 = vmul.f32 %v446_v13, %v437_v14  ;;  %v976_v17 = vpop.f32.mrb[11].mxu0 }
 0x568   :  { %v1027_v18 = vpack.c.bf16 %v450_v16, %v449_v15 }
 0x56a   :  { %1028 = vmatpush3.bf16.msra.mxu1 %v1027_v18 }
 0x56b   :  { %998 = vmatprep.subr.bf16.mxu1 %v1070_v0 }
 0x56d   :  { %982 = vmatmul.mubr.msk.f32.vlgmr.msra.gmra.mrb[4].mxu1 %vm123_vm2, %v51_v19 }
 0x56e   :  { %1002 = vmatprep.mubr.msk.bf16.mxu1 %vm1071_vm0, %v1070_v0  ;;  %999 = vmatpush3.bf16.msra.mxu1 %v1050_v33 }
 0x56f   :  { %1000 = vmatprep.subr.bf16.mxu1 %v1070_v0 }
 0x572   :  { %1001 = vmatpush3.bf16.msra.mxu1 %v1051_v34 }
 0x573   :  { %1006 = vmatprep.subr.bf16.mxu1 %v1070_v0 }
 0x640   :  { %v520_v21 = vpop.f32.mrb[4].mxu1 }
 0x641   :  { %v524_v22 = vpack.c.bf16 %v520_v21, %v520_v21  ;;  %v983_v23 = vpop.f32.mrb[5].mxu1 }
 0x643   :  { %989 = vmatmul.mubr.msk.bf16.vlgmr.msra.gmra.mrb[12].mxu0 %vm78_vm1, %v524_v22 }
 0x644   :  { %993 = vmatpush3.bf16.msra.mxu0 %v1143_v3  ;;  %994 = vmatprep.mubr.msk.bf16.mxu0 %vm1071_vm0, %v1070_v0 }
 0x64f   :  { %995 = vmatmul.mubr.msk.bf16.vlgmr.msra.gmra.mrb[12].mxu0 %vm123_vm2, %v46_v24 }
 0x722   :  { %v627_v26 = vpop.f32.mrb[12].mxu0 }
 0x723   :  { %v1029_v27 = vadd.f32 %v888_v25, %v627_v26  ;;  %v996_v28 = vpop.f32.mrb[13].mxu0 }
 0x724   :  { %v630_v29 = vpop.f32.mrb[14].mxu0  ;;  %v905_v28 = vld [vmem:[%s1281_s8 + $0x6] ss:$0 sm:$0xff] }
 0x725   :  { %v997_v30 = vpop.f32.mrb[15].mxu0  ;;  %v636_v3 = vsel %vm635_vm5, %v1029_v27, 0.0  ;;  %v639_v31 = vmul.f32 %v1029_v27, %v1029_v27 }
 0x726   :  { %637 = vadd.xlane.f32.xlu0 %v636_v3  ;;  %v906_v30 = vld [vmem:[%s1281_s8 + $0x7] ss:$0 sm:$0xff] }
 0x727   :  { %v640_v32 = vsel %vm635_vm5, %v639_v31, 0.0  ;;  %v907_v31 = vld [vmem:[%s1281_s8 + $0x8] ss:$0 sm:$0xff] }
 0x728   :  { %641 = vadd.xlane.f32.xlu1 %v640_v32 }
 0x7b3   :  { %v638_v35 = vpop.xlane.xlu0 %637 }
 0x7b4   :  { %v643_v36 = vmul.f32 0.03125, %v638_v35  ;;  %v908_v35 = vld [vmem:[%s1281_s8 + $0x9] ss:$0 sm:$0xff] }
 0x7b5   :  { %v642_v37 = vpop.xlane.xlu1 %641 }
 0x7b6   :  { %v645_v38 = vmul.f32 %v643_v36, %v643_v36  ;;  %v644_v39 = vmul.f32 0.03125, %v642_v37  ;;  %v648_v43 = vsub.f32 %v1029_v27, %v643_v36 }
 0x7b8   :  { %v646_v40 = vsub.f32 %v644_v39, %v645_v38 }
 0x7ba   :  { %v647_v41 = vmax.f32 %v646_v40, 0.0 }
 0x7bc   :  { %v649_v42 = vadd.f32 1e-12, %v647_v41 }
 0x7be   :  { %1064 = vrsqrt.f32 %v649_v42 }
 0x7c8   :  { %v1065_v44 = vpop.eup %1064 }
 0x7c9   :  { %v651_v46 = vmul.f32 %v1065_v44, %v648_v43 }
 0x7cb   :  { %v656_v48 = vmul.f32 %v893_v45, %v651_v46 }
 0x7cd   :  { %v661_v49 = vadd.f32 %v894_v47, %v656_v48 }
 0x7cf   :  { %v662_v50 = vpack.c.bf16 %v661_v49, %v661_v49 }
 0x7d1   :  { %1003 = vmatmul.mubr.msk.bf16.vlgmr.msra.gmra.mrb[8].mxu1 %vm78_vm1, %v662_v50 }
 0x7d2   :  { %1014 = vmatprep.mubr.msk.bf16.mxu1 %vm1071_vm0, %v1070_v0  ;;  %1007 = vmatpush3.bf16.msra.mxu1 %v1052_v51 }
 0x7d3   :  { %1008 = vmatprep.subr.bf16.mxu1 %v1070_v0 }
 0x7d6   :  { %1009 = vmatpush3.bf16.msra.mxu1 %v1053_v52 }
 0x7d7   :  { %1010 = vmatprep.subr.bf16.mxu1 %v1070_v0 }
 0x7da   :  { %1011 = vmatpush3.bf16.msra.mxu1 %v1054_v53 }
 0x7db   :  { %1012 = vmatprep.subr.bf16.mxu1 %v1070_v0 }
 0x7de   :  { %1013 = vmatpush3.bf16.msra.mxu1 %v1055_v54 }
 0x8a4   :  { %v721_v56 = vpop.f32.mrb[8].mxu1 }
 0x8a5   :  { %v722_v57 = vadd.f32 %v895_v55, %v721_v56  ;;  %v1004_v58 = vpop.f32.mrb[9].mxu1 }
 0x8a6   :  { %v724_v59 = vpop.f32.mrb[10].mxu1 }
 0x8a7   :  { %v727_v60 = vmul.f32 %v722_v57, %v722_v57  ;;  %v1005_v61 = vpop.f32.mrb[11].mxu1 }
 0x8a9   :  { %v728_v62 = vmul.f32 %v727_v60, %v722_v57 }
 0x8ab   :  { %v729_v63 = vmul.f32 0.044715, %v728_v62 }
 0x8ad   :  { %v730_v1 = vadd.f32 %v729_v63, %v722_v57 }
 0x8af   :  { %v731_v2 = vmul.f32 0.7978846, %v730_v1 }
 0x8b1   :  { %1066 = vtanh.f32 %v731_v2 }
 0x8bb   :  { %v1067_v0 = vpop.eup %1066 }
 0x8bc   :  { %v733_v4 = vadd.f32 1.0, %v1067_v0 }
 0x8be   :  { %v734_v5 = vmul.f32 0.5, %v733_v4 }
 0x8c0   :  { %v735_v6 = vmul.f32 %v734_v5, %v722_v57 }
 0x8c2   :  { %v736_v7 = vpack.c.bf16 %v735_v6, %v735_v6 }
 0x8c4   :  { %1015 = vmatmul.mubr.msk.bf16.vlgmr.msra.gmra.mrb[12].mxu1 %vm774_vm6, %v736_v7 }
 0x997   :  { %v812_v9 = vpop.f32.mrb[12].mxu1 }
 0x998   :  { %v813_v10 = vadd.f32 %v899_v8, %v812_v9  ;;  %v1016_v11 = vpop.f32.mrb[13].mxu1 }
 0x999   :  { %v815_v12 = vpop.f32.mrb[14].mxu1 }
 0x99a   :  { %v818_v13 = vadd.f32 %v813_v10, %v661_v49  ;;  %v1017_v14 = vpop.f32.mrb[15].mxu1 }
 0x99c   :  { %v821_v15 = vsel %vm635_vm5, %v818_v13, 0.0  ;;  %v824_v16 = vmul.f32 %v818_v13, %v818_v13 }
 0x99d   :  { %822 = vadd.xlane.f32.xlu0 %v821_v15 }
 0x99e   :  { %v825_v17 = vsel %vm635_vm5, %v824_v16, 0.0 }
 0x9a1   :  { %826 = vadd.xlane.f32.xlu0 %v825_v17 }
 0xa2a   :  { %v823_v18 = vpop.xlane.xlu0 %822 }
 0xa2b   :  { %v828_v19 = vmul.f32 0.03125, %v823_v18 }
 0xa2d   :  { %v830_v21 = vmul.f32 %v828_v19, %v828_v19  ;;  %v833_v26 = vsub.f32 %v818_v13, %v828_v19 }
 0xa2e   :  { %v827_v20 = vpop.xlane.xlu0 %826 }
 0xa2f   :  { %v829_v22 = vmul.f32 0.03125, %v827_v20 }
 0xa31   :  { %v831_v23 = vsub.f32 %v829_v22, %v830_v21 }
 0xa33   :  { %v832_v24 = vmax.f32 %v831_v23, 0.0 }
 0xa35   :  { %v834_v25 = vadd.f32 1e-12, %v832_v24 }
 0xa37   :  { %1068 = vrsqrt.f32 %v834_v25 }
 0xa41   :  { %v1069_v27 = vpop.eup %1068 }
 0xa42   :  { %v836_v29 = vmul.f32 %v1069_v27, %v833_v26 }
 0xa44   :  { %v841_v3 = vmul.f32 %v905_v28, %v836_v29 }
 0xa46   :  { %v846_v32 = vadd.f32 %v906_v30, %v841_v3 }
 0xa48   :  { %v853_v33 = vmul.f32 %v907_v31, %v846_v32 }
 0xa4a   :  { %v854_v34 = vsel %vm635_vm5, %v853_v33, 0.0 }
 0xa4b   :  { %855 = vadd.xlane.f32.xlu1 %v854_v34 }
 0xad8   :  { %v856_v36 = vpop.xlane.xlu1 %855 }
 0xad9   :  { %v861_v37 = vadd.f32 %v908_v35, %v856_v36 }
 0xadb   :  { %864 = vperm.xlu0 %1042, %v861_v37  }
 0xb5a   :  { %v865_v38 = vpop.permute.xlu0 %864 }
 0xb5b   :  { %867 = vst [vmem:[%s1287_s9] sm:$0x3] %v865_v38 }

</bundles_post_ra>
